<compile_context>
chip_gen: v6e
topology: v6e:2x2x1
jax: 0.10.0
libtpu: 0.0.40
codegen_flags: <defaults>
</compile_context>

<pallas_src>
import functools

import jax
import jax.numpy as jnp
from jax.experimental import pallas as pl
from jax.experimental.pallas import tpu as pltpu


class _VmemBudgetError(ValueError):
    """Weights do not fit resident in VMEM on this generation."""


def _round_up(n, m):
    return (n + m - 1) // m * m


def _cdiv(a, b):
    return (a + b - 1) // b


def _device_kind():
    try:
        return jax.devices()[0].device_kind.lower()
    except Exception:
        return ""


def _generation_defaults():
    """Returns (lane_align, default block_batch) for the local TPU generation."""
    kind = _device_kind()
    if "v7" in kind:
        return 256, 256      # 2x256x256 MXU, 64 MiB VMEM/TC -> smaller batch tile
    if "v6" in kind:
        return 256, 512      # 2x256x256 MXU, 128 MiB VMEM
    return 128, 512          # v5e and older: 128x128 MXU, 128 MiB VMEM


def _vmem_budget_bytes():
    """Usable VMEM budget (bytes) with ~15% headroom."""
    kind = _device_kind()
    phys_guess = (64 << 20) if "v7" in kind else (128 << 20)
    try:
        phys = int(pltpu.get_tpu_info().vmem_capacity_bytes)
        phys = min(phys, phys_guess) if phys > 0 else phys_guess
    except Exception:
        phys = phys_guess
    return int(phys * 0.85)


def _mlp_kernel(x_ref, w1_ref, b1_ref, w2_ref, b2_ref, w3_ref, b3_ref, o_ref):
    """Three MXU matmuls (f32 accumulation) + VPU bias/ReLU on one batch tile.

    Weights/biases stay VMEM-resident (constant index_map, single-buffered);
    activations flow straight from ReLU into the next dot.
    """
    cdt = w1_ref.dtype
    h1 = jnp.dot(x_ref[...], w1_ref[...], preferred_element_type=jnp.float32)
    h1 = jnp.maximum(h1 + b1_ref[...], 0.0)
    h2 = jnp.dot(h1.astype(cdt), w2_ref[...], preferred_element_type=jnp.float32)
    h2 = jnp.maximum(h2 + b2_ref[...], 0.0)
    out = jnp.dot(h2.astype(cdt), w3_ref[...], preferred_element_type=jnp.float32)
    o_ref[...] = (out + b3_ref[...]).astype(o_ref.dtype)


@functools.partial(
    jax.jit,
    static_argnames=("block_batch", "compute_dtype", "lane_align",
                     "single_buffer_weights"))
def _mlp_forward_impl(x, w1, b1, w2, b2, w3, b3, *, block_batch, compute_dtype,
                      lane_align, single_buffer_weights):
    compute_dtype = jnp.dtype(compute_dtype)
    out_dtype = x.dtype

    B, indim = x.shape
    hiddim = w1.shape[1]
    outdim = w3.shape[1]

    LANE = lane_align
    SUB = 16 if compute_dtype.itemsize == 2 else 8   # sublane packing

    indim_p = _round_up(indim, LANE)
    hid_p = _round_up(hiddim, LANE)
    out_p = _round_up(outdim, LANE)

    cd = compute_dtype.itemsize
    od = jnp.dtype(out_dtype).itemsize

    # ---- VMEM economics -----------------------------------------------------
    weight_bytes = (indim_p * hid_p + hid_p * hid_p + hid_p * out_p) * cd
    bias_bytes = (2 * hid_p + out_p) * 4               # biases stay f32
    w_factor = 1 if single_buffer_weights else 2
    resident_bytes = w_factor * (weight_bytes + bias_bytes)

    def tile_io_bytes(tm):                              # double-buffered x / out
        return 2 * tm * indim_p * cd + 2 * tm * out_p * od

    slack = 2 << 20                                     # Mosaic internal scratch
    budget = _vmem_budget_bytes()

    if resident_bytes + tile_io_bytes(SUB) + slack > budget:
        # TODO(synk): weight-tiled fallback (grid axis over hidden/output
        # features with a pl.when-init accumulator) for weights too large to
        # keep resident — relevant on v7x for hiddim >~ 2.5k in bf16.
        raise _VmemBudgetError(
            f"MLP weights need {resident_bytes / 2**20:.1f} MiB resident VMEM "
            f"but only {budget / 2**20:.1f} MiB is available on this TPU "
            "generation; hiddim is too large for the all-weights-resident kernel.")

    # ---- batch tile / grid selection ----------------------------------------
    # Aim for >= 8 grid steps (so pipelining and v7x megacore engage), respect
    # block_batch, shrink for VMEM, then rebalance so B_p divides tightly.
    B_sub = _round_up(B, SUB)
    tm_cap = _round_up(max(int(block_batch), SUB), SUB)
    tm_pipe = _round_up(_cdiv(B_sub, 8), SUB)
    TM = max(SUB, min(tm_cap, tm_pipe, B_sub))
    while TM > SUB and resident_bytes + tile_io_bytes(TM) + slack > budget:
        TM = max(SUB, _round_up(TM // 2, SUB))
    n_tiles = _cdiv(B_sub, TM)
    TM = _round_up(_cdiv(B_sub, n_tiles), SUB)          # never increases TM
    B_p = n_tiles * TM

    vmem_limit = int(min(budget,
                         max(resident_bytes + tile_io_bytes(TM) + slack,
                             16 << 20)))

    # ---- padding (semantics-preserving) --------------------------------------
    def pad2(a, rows, cols, dtype):
        a = jnp.asarray(a, dtype)
        if a.ndim == 1:
            a = a.reshape(1, -1)
        pr, pc = rows - a.shape[0], cols - a.shape[1]
        if pr or pc:
            a = jnp.pad(a, ((0, pr), (0, pc)))
        return a

    # Padded contraction rows are zero, padded bias columns give ReLU(0)=0 which
    # feeds zero weight rows downstream, padded batch rows / output columns are
    # sliced away at the end.
    x_p = pad2(x, B_p, indim_p, compute_dtype)
    w1_p = pad2(w1, indim_p, hid_p, compute_dtype)
    w2_p = pad2(w2, hid_p, hid_p, compute_dtype)
    w3_p = pad2(w3, hid_p, out_p, compute_dtype)
    b1_p = pad2(b1, 1, hid_p, jnp.float32)
    b2_p = pad2(b2, 1, hid_p, jnp.float32)
    b3_p = pad2(b3, 1, out_p, jnp.float32)

    def resident_spec(shape):
        # Constant index_map -> block is loaded once and stays in VMEM; with
        # Buffered(1) the unused second pipeline buffer is not allocated.
        if single_buffer_weights:
            return pl.BlockSpec(shape, lambda i: (0, 0),
                                pipeline_mode=pl.Buffered(1))
        return pl.BlockSpec(shape, lambda i: (0, 0))

    flops = 2 * B_p * (indim_p * hid_p + hid_p * hid_p + hid_p * out_p)
    bytes_accessed = (B_p * indim_p * cd + weight_bytes + bias_bytes
                      + B_p * out_p * od)

    out_padded = pl.pallas_call(
        _mlp_kernel,
        out_shape=jax.ShapeDtypeStruct((B_p, out_p), out_dtype),
        grid_spec=pltpu.PrefetchScalarGridSpec(
            num_scalar_prefetch=0,
            grid=(n_tiles,),
            in_specs=[
                pl.BlockSpec((TM, indim_p), lambda i: (i, 0)),   # x tile (pipelined)
                resident_spec((indim_p, hid_p)),                 # W1 (resident)
                resident_spec((1, hid_p)),                       # b1
                resident_spec((hid_p, hid_p)),                   # W2
                resident_spec((1, hid_p)),                       # b2
                resident_spec((hid_p, out_p)),                   # W3
                resident_spec((1, out_p)),                       # b3
            ],
            out_specs=pl.BlockSpec((TM, out_p), lambda i: (i, 0)),
        ),
        compiler_params=pltpu.CompilerParams(
            dimension_semantics=("parallel",),     # megacore sharding on v7x
            vmem_limit_bytes=vmem_limit,
        ),
        cost_estimate=pl.CostEstimate(flops=flops, transcendentals=0,
                                      bytes_accessed=bytes_accessed),
    )(x_p, w1_p, b1_p, w2_p, b2_p, w3_p, b3_p)

    return out_padded[:B, :outdim]


def mlp_forward(x, w1, b1, w2, b2, w3, b3, *, block_batch=None,
                compute_dtype=None):
    """Fused MLP forward: ReLU(ReLU(x@W1+b1)@W2+b2)@W3+b3.

    Weights are (in_features, out_features) (pre-transposed vs. PyTorch).
    compute_dtype defaults to bfloat16 when x is f32 (MXU-native fast path;
    f32 accumulation / bias / ReLU).  Pass jnp.float32 for exact semantics.
    """
    lane_align, default_bb = _generation_defaults()
    if block_batch is None:
        block_batch = default_bb
    if compute_dtype is None:
        compute_dtype = jnp.bfloat16 if x.dtype == jnp.float32 else x.dtype
    compute_dtype = jnp.dtype(compute_dtype)

    kwargs = dict(block_batch=int(block_batch), compute_dtype=compute_dtype,
                  lane_align=int(lane_align))
    try:
        return _mlp_forward_impl(x, w1, b1, w2, b2, w3, b3,
                                 single_buffer_weights=True, **kwargs)
    except _VmemBudgetError:
        raise
    except Exception:
        # Older JAX may reject pipeline_mode=pl.Buffered(1); fall back to the
        # default double-buffered resident weights.
        return _mlp_forward_impl(x, w1, b1, w2, b2, w3, b3,
                                 single_buffer_weights=False, **kwargs)


def init_mlp_params(key, indim, hiddim, outdim, dtype=jnp.float32):
    """nn.Linear-style init (uniform +/- 1/sqrt(fan_in)); weights (in, out)."""
    ks = jax.random.split(key, 6)

    def linear(kw, kb, fan_in, fan_out):
        bound = 1.0 / jnp.sqrt(fan_in)
        w = jax.random.uniform(kw, (fan_in, fan_out), dtype, -bound, bound)
        b = jax.random.uniform(kb, (1, fan_out), dtype, -bound, bound)
        return w, b

    w1, b1 = linear(ks[0], ks[1], indim, hiddim)
    w2, b2 = linear(ks[2], ks[3], hiddim, hiddim)
    w3, b3 = linear(ks[4], ks[5], hiddim, outdim)
    return w1, b1, w2, b2, w3, b3


if __name__ == "__main__":
    key = jax.random.PRNGKey(0)
    k_x, k_p = jax.random.split(key)

    # Small shapes consistent with the module; the wrapper pads to MXU/lane
    # granularity internally.  (At toy sizes call overhead dominates — the
    # design targets larger B / hiddim.)
    batch, indim, hiddim, outdim = 8, 16, 32, 8
    x = jax.random.normal(k_x, (batch, indim), jnp.float32)
    w1, b1, w2, b2, w3, b3 = init_mlp_params(k_p, indim, hiddim, outdim)

    # Pure-JAX reference (PyTorch MLP forward semantics).
    h1 = jnp.maximum(x @ w1 + b1, 0.0)
    h2 = jnp.maximum(h1 @ w2 + b2, 0.0)
    ref = h2 @ w3 + b3

    # Exact f32 path.
    out_f32 = mlp_forward(x, w1, b1, w2, b2, w3, b3, compute_dtype=jnp.float32)
    jax.block_until_ready(out_f32)
    assert out_f32.shape == (batch, outdim)
    assert jnp.allclose(out_f32, ref, atol=1e-4, rtol=1e-4), "f32 path mismatch"

    # Default fast path (bf16 MXU inputs, f32 accumulation) — looser tolerance.
    out = mlp_forward(x, w1, b1, w2, b2, w3, b3)
    jax.block_until_ready(out)
    assert out.shape == (batch, outdim)
    assert jnp.allclose(out, ref, atol=5e-2, rtol=5e-2), "bf16 path mismatch"

    print("KERNEL_OK")
</pallas_src>

<mosaic_0001>
module attributes {stable_mosaic.version = 11 : i64} {
  func.func @_mlp_kernel(%arg0: i32, %arg1: memref<8x128xf32, #tpu.memory_space<vmem>>, %arg2: memref<128x128xf32, #tpu.memory_space<vmem>>, %arg3: memref<1x128xf32, #tpu.memory_space<vmem>>, %arg4: memref<128x128xf32, #tpu.memory_space<vmem>>, %arg5: memref<1x128xf32, #tpu.memory_space<vmem>>, %arg6: memref<128x128xf32, #tpu.memory_space<vmem>>, %arg7: memref<1x128xf32, #tpu.memory_space<vmem>>, %arg8: memref<8x128xf32, #tpu.memory_space<vmem>>) attributes {dimension_semantics = [#tpu.dimension_semantics<parallel>], iteration_bounds = array<i64: 1>, scalar_prefetch = 0 : i64, scratch_operands = 0 : i64, tpu.core_type = #tpu.core_type<tc>, window_params = [{transform_indices = @transform_0, window_bounds = array<i64: 8, 128>}, {pipeline_mode = #tpu.pipeline_mode<synchronous>, transform_indices = @transform_1, window_bounds = array<i64: 128, 128>}, {pipeline_mode = #tpu.pipeline_mode<synchronous>, transform_indices = @transform_2, window_bounds = array<i64: 1, 128>}, {pipeline_mode = #tpu.pipeline_mode<synchronous>, transform_indices = @transform_3, window_bounds = array<i64: 128, 128>}, {pipeline_mode = #tpu.pipeline_mode<synchronous>, transform_indices = @transform_4, window_bounds = array<i64: 1, 128>}, {pipeline_mode = #tpu.pipeline_mode<synchronous>, transform_indices = @transform_5, window_bounds = array<i64: 128, 128>}, {pipeline_mode = #tpu.pipeline_mode<synchronous>, transform_indices = @transform_6, window_bounds = array<i64: 1, 128>}, {transform_indices = @transform_7, window_bounds = array<i64: 8, 128>}]} {
    %c0 = arith.constant 0 : index
    %c0_0 = arith.constant 0 : index
    %0 = vector.load %arg1[%c0, %c0_0] : memref<8x128xf32, #tpu.memory_space<vmem>>, vector<8x128xf32>
    %c0_1 = arith.constant 0 : index
    %c0_2 = arith.constant 0 : index
    %1 = vector.load %arg2[%c0_1, %c0_2] : memref<128x128xf32, #tpu.memory_space<vmem>>, vector<128x128xf32>
    %cst = arith.constant dense<0.000000e+00> : vector<8x128xf32>
    %2 = tpu.matmul %0, %1, %cst {dimension_numbers = #tpu.dot_dimension_numbers<[1], [0], [0], [1], [0, 0, 1, 1], [], []>} : vector<8x128xf32>, vector<128x128xf32>, vector<8x128xf32> -> vector<8x128xf32>
    %c0_3 = arith.constant 0 : index
    %c0_4 = arith.constant 0 : index
    %3 = vector.load %arg3[%c0_3, %c0_4] : memref<1x128xf32, #tpu.memory_space<vmem>>, vector<1x128xf32>
    %4 = vector.broadcast %3 : vector<1x128xf32> to vector<8x128xf32>
    %5 = arith.addf %2, %4 : vector<8x128xf32>
    %cst_5 = arith.constant 0.000000e+00 : f32
    %6 = vector.broadcast %cst_5 : f32 to vector<8x128xf32>
    %7 = arith.maximumf %5, %6 : vector<8x128xf32>
    %c0_6 = arith.constant 0 : index
    %c0_7 = arith.constant 0 : index
    %8 = vector.load %arg4[%c0_6, %c0_7] : memref<128x128xf32, #tpu.memory_space<vmem>>, vector<128x128xf32>
    %cst_8 = arith.constant dense<0.000000e+00> : vector<8x128xf32>
    %9 = tpu.matmul %7, %8, %cst_8 {dimension_numbers = #tpu.dot_dimension_numbers<[1], [0], [0], [1], [0, 0, 1, 1], [], []>} : vector<8x128xf32>, vector<128x128xf32>, vector<8x128xf32> -> vector<8x128xf32>
    %c0_9 = arith.constant 0 : index
    %c0_10 = arith.constant 0 : index
    %10 = vector.load %arg5[%c0_9, %c0_10] : memref<1x128xf32, #tpu.memory_space<vmem>>, vector<1x128xf32>
    %11 = vector.broadcast %10 : vector<1x128xf32> to vector<8x128xf32>
    %12 = arith.addf %9, %11 : vector<8x128xf32>
    %cst_11 = arith.constant 0.000000e+00 : f32
    %13 = vector.broadcast %cst_11 : f32 to vector<8x128xf32>
    %14 = arith.maximumf %12, %13 : vector<8x128xf32>
    %c0_12 = arith.constant 0 : index
    %c0_13 = arith.constant 0 : index
    %15 = vector.load %arg6[%c0_12, %c0_13] : memref<128x128xf32, #tpu.memory_space<vmem>>, vector<128x128xf32>
    %cst_14 = arith.constant dense<0.000000e+00> : vector<8x128xf32>
    %16 = tpu.matmul %14, %15, %cst_14 {dimension_numbers = #tpu.dot_dimension_numbers<[1], [0], [0], [1], [0, 0, 1, 1], [], []>} : vector<8x128xf32>, vector<128x128xf32>, vector<8x128xf32> -> vector<8x128xf32>
    %c0_15 = arith.constant 0 : index
    %c0_16 = arith.constant 0 : index
    %17 = vector.load %arg7[%c0_15, %c0_16] : memref<1x128xf32, #tpu.memory_space<vmem>>, vector<1x128xf32>
    %18 = vector.broadcast %17 : vector<1x128xf32> to vector<8x128xf32>
    %19 = arith.addf %16, %18 : vector<8x128xf32>
    %c0_17 = arith.constant 0 : index
    %c0_18 = arith.constant 0 : index
    %20 = vector.load %arg8[%c0_17, %c0_18] : memref<8x128xf32, #tpu.memory_space<vmem>>, vector<8x128xf32>
    tpu.vector_store %arg8[%c0_17, %c0_18], %19 {strides = array<i32>} : memref<8x128xf32, #tpu.memory_space<vmem>>, vector<8x128xf32>,
    return
  }
  func.func @transform_0(%arg0: i32) -> (i32, i32) {
    %c0_i32 = arith.constant 0 : i32
    %c0_i32_0 = arith.constant 0 : i32
    return %arg0, %c0_i32 : i32, i32
  }
  func.func @transform_1(%arg0: i32) -> (i32, i32) {
    %c0_i32 = arith.constant 0 : i32
    %c0_i32_0 = arith.constant 0 : i32
    %c0_i32_1 = arith.constant 0 : i32
    return %c0_i32, %c0_i32_0 : i32, i32
  }
  func.func @transform_2(%arg0: i32) -> (i32, i32) {
    %c0_i32 = arith.constant 0 : i32
    %c0_i32_0 = arith.constant 0 : i32
    %c0_i32_1 = arith.constant 0 : i32
    return %c0_i32, %c0_i32_0 : i32, i32
  }
  func.func @transform_3(%arg0: i32) -> (i32, i32) {
    %c0_i32 = arith.constant 0 : i32
    %c0_i32_0 = arith.constant 0 : i32
    %c0_i32_1 = arith.constant 0 : i32
    return %c0_i32, %c0_i32_0 : i32, i32
  }
  func.func @transform_4(%arg0: i32) -> (i32, i32) {
    %c0_i32 = arith.constant 0 : i32
    %c0_i32_0 = arith.constant 0 : i32
    %c0_i32_1 = arith.constant 0 : i32
    return %c0_i32, %c0_i32_0 : i32, i32
  }
  func.func @transform_5(%arg0: i32) -> (i32, i32) {
    %c0_i32 = arith.constant 0 : i32
    %c0_i32_0 = arith.constant 0 : i32
    %c0_i32_1 = arith.constant 0 : i32
    return %c0_i32, %c0_i32_0 : i32, i32
  }
  func.func @transform_6(%arg0: i32) -> (i32, i32) {
    %c0_i32 = arith.constant 0 : i32
    %c0_i32_0 = arith.constant 0 : i32
    %c0_i32_1 = arith.constant 0 : i32
    return %c0_i32, %c0_i32_0 : i32, i32
  }
  func.func @transform_7(%arg0: i32) -> (i32, i32) {
    %c0_i32 = arith.constant 0 : i32
    %c0_i32_0 = arith.constant 0 : i32
    return %arg0, %c0_i32 : i32, i32
  }
}

module attributes {stable_mosaic.version = 11 : i64} {
  func.func @_mlp_kernel(%arg0: i32, %arg1: memref<8x128xf32, #tpu.memory_space<vmem>>, %arg2: memref<128x128xf32, #tpu.memory_space<vmem>>, %arg3: memref<1x128xf32, #tpu.memory_space<vmem>>, %arg4: memref<128x128xf32, #tpu.memory_space<vmem>>, %arg5: memref<1x128xf32, #tpu.memory_space<vmem>>, %arg6: memref<128x128xf32, #tpu.memory_space<vmem>>, %arg7: memref<1x128xf32, #tpu.memory_space<vmem>>, %arg8: memref<8x128xf32, #tpu.memory_space<vmem>>) attributes {dimension_semantics = [#tpu.dimension_semantics<parallel>], iteration_bounds = array<i64: 1>, scalar_prefetch = 0 : i64, scratch_operands = 0 : i64, tpu.core_type = #tpu.core_type<tc>, window_params = [{transform_indices = @transform_0, window_bounds = array<i64: 8, 128>}, {pipeline_mode = #tpu.pipeline_mode<synchronous>, transform_indices = @transform_1, window_bounds = array<i64: 128, 128>}, {pipeline_mode = #tpu.pipeline_mode<synchronous>, transform_indices = @transform_2, window_bounds = array<i64: 1, 128>}, {pipeline_mode = #tpu.pipeline_mode<synchronous>, transform_indices = @transform_3, window_bounds = array<i64: 128, 128>}, {pipeline_mode = #tpu.pipeline_mode<synchronous>, transform_indices = @transform_4, window_bounds = array<i64: 1, 128>}, {pipeline_mode = #tpu.pipeline_mode<synchronous>, transform_indices = @transform_5, window_bounds = array<i64: 128, 128>}, {pipeline_mode = #tpu.pipeline_mode<synchronous>, transform_indices = @transform_6, window_bounds = array<i64: 1, 128>}, {transform_indices = @transform_7, window_bounds = array<i64: 8, 128>}]} {
    %c0 = arith.constant 0 : index
    %c0_0 = arith.constant 0 : index
    %0 = vector.load %arg1[%c0, %c0_0] : memref<8x128xf32, #tpu.memory_space<vmem>>, vector<8x128xf32>
    %c0_1 = arith.constant 0 : index
    %c0_2 = arith.constant 0 : index
    %1 = vector.load %arg2[%c0_1, %c0_2] : memref<128x128xf32, #tpu.memory_space<vmem>>, vector<128x128xf32>
    %cst = arith.constant dense<0.000000e+00> : vector<8x128xf32>
    %2 = tpu.matmul %0, %1, %cst {dimension_numbers = #tpu.dot_dimension_numbers<[1], [0], [0], [1], [0, 0, 1, 1], [], []>} : vector<8x128xf32>, vector<128x128xf32>, vector<8x128xf32> -> vector<8x128xf32>
    %c0_3 = arith.constant 0 : index
    %c0_4 = arith.constant 0 : index
    %3 = vector.load %arg3[%c0_3, %c0_4] : memref<1x128xf32, #tpu.memory_space<vmem>>, vector<1x128xf32>
    %4 = vector.broadcast %3 : vector<1x128xf32> to vector<8x128xf32>
    %5 = arith.addf %2, %4 : vector<8x128xf32>
    %cst_5 = arith.constant 0.000000e+00 : f32
    %6 = vector.broadcast %cst_5 : f32 to vector<8x128xf32>
    %7 = arith.maximumf %5, %6 : vector<8x128xf32>
    %c0_6 = arith.constant 0 : index
    %c0_7 = arith.constant 0 : index
    %8 = vector.load %arg4[%c0_6, %c0_7] : memref<128x128xf32, #tpu.memory_space<vmem>>, vector<128x128xf32>
    %cst_8 = arith.constant dense<0.000000e+00> : vector<8x128xf32>
    %9 = tpu.matmul %7, %8, %cst_8 {dimension_numbers = #tpu.dot_dimension_numbers<[1], [0], [0], [1], [0, 0, 1, 1], [], []>} : vector<8x128xf32>, vector<128x128xf32>, vector<8x128xf32> -> vector<8x128xf32>
    %c0_9 = arith.constant 0 : index
    %c0_10 = arith.constant 0 : index
    %10 = vector.load %arg5[%c0_9, %c0_10] : memref<1x128xf32, #tpu.memory_space<vmem>>, vector<1x128xf32>
    %11 = vector.broadcast %10 : vector<1x128xf32> to vector<8x128xf32>
    %12 = arith.addf %9, %11 : vector<8x128xf32>
    %cst_11 = arith.constant 0.000000e+00 : f32
    %13 = vector.broadcast %cst_11 : f32 to vector<8x128xf32>
    %14 = arith.maximumf %12, %13 : vector<8x128xf32>
    %c0_12 = arith.constant 0 : index
    %c0_13 = arith.constant 0 : index
    %15 = vector.load %arg6[%c0_12, %c0_13] : memref<128x128xf32, #tpu.memory_space<vmem>>, vector<128x128xf32>
    %cst_14 = arith.constant dense<0.000000e+00> : vector<8x128xf32>
    %16 = tpu.matmul %14, %15, %cst_14 {dimension_numbers = #tpu.dot_dimension_numbers<[1], [0], [0], [1], [0, 0, 1, 1], [], []>} : vector<8x128xf32>, vector<128x128xf32>, vector<8x128xf32> -> vector<8x128xf32>
    %c0_15 = arith.constant 0 : index
    %c0_16 = arith.constant 0 : index
    %17 = vector.load %arg7[%c0_15, %c0_16] : memref<1x128xf32, #tpu.memory_space<vmem>>, vector<1x128xf32>
    %18 = vector.broadcast %17 : vector<1x128xf32> to vector<8x128xf32>
    %19 = arith.addf %16, %18 : vector<8x128xf32>
    %c0_17 = arith.constant 0 : index
    %c0_18 = arith.constant 0 : index
    %20 = vector.load %arg8[%c0_17, %c0_18] : memref<8x128xf32, #tpu.memory_space<vmem>>, vector<8x128xf32>
    tpu.vector_store %arg8[%c0_17, %c0_18], %19 {strides = array<i32>} : memref<8x128xf32, #tpu.memory_space<vmem>>, vector<8x128xf32>,
    return
  }
  func.func @transform_0(%arg0: i32) -> (i32, i32) {
    %c0_i32 = arith.constant 0 : i32
    %c0_i32_0 = arith.constant 0 : i32
    return %arg0, %c0_i32 : i32, i32
  }
  func.func @transform_1(%arg0: i32) -> (i32, i32) {
    %c0_i32 = arith.constant 0 : i32
    %c0_i32_0 = arith.constant 0 : i32
    %c0_i32_1 = arith.constant 0 : i32
    return %c0_i32, %c0_i32_0 : i32, i32
  }
  func.func @transform_2(%arg0: i32) -> (i32, i32) {
    %c0_i32 = arith.constant 0 : i32
    %c0_i32_0 = arith.constant 0 : i32
    %c0_i32_1 = arith.constant 0 : i32
    return %c0_i32, %c0_i32_0 : i32, i32
  }
  func.func @transform_3(%arg0: i32) -> (i32, i32) {
    %c0_i32 = arith.constant 0 : i32
    %c0_i32_0 = arith.constant 0 : i32
    %c0_i32_1 = arith.constant 0 : i32
    return %c0_i32, %c0_i32_0 : i32, i32
  }
  func.func @transform_4(%arg0: i32) -> (i32, i32) {
    %c0_i32 = arith.constant 0 : i32
    %c0_i32_0 = arith.constant 0 : i32
    %c0_i32_1 = arith.constant 0 : i32
    return %c0_i32, %c0_i32_0 : i32, i32
  }
  func.func @transform_5(%arg0: i32) -> (i32, i32) {
    %c0_i32 = arith.constant 0 : i32
    %c0_i32_0 = arith.constant 0 : i32
    %c0_i32_1 = arith.constant 0 : i32
    return %c0_i32, %c0_i32_0 : i32, i32
  }
  func.func @transform_6(%arg0: i32) -> (i32, i32) {
    %c0_i32 = arith.constant 0 : i32
    %c0_i32_0 = arith.constant 0 : i32
    %c0_i32_1 = arith.constant 0 : i32
    return %c0_i32, %c0_i32_0 : i32, i32
  }
  func.func @transform_7(%arg0: i32) -> (i32, i32) {
    %c0_i32 = arith.constant 0 : i32
    %c0_i32_0 = arith.constant 0 : i32
    return %arg0, %c0_i32 : i32, i32
  }
}

</mosaic_0001>

<bundles_post_ra>
// kernel: _mlp_forward_impl.1
= control target key start
LH: loop header
LB: loop body
LE: loop exit
PB: predicated region body
PF: predicated region fallthrough
CT: control target
= control target key end

     0   :  { %v508_v1 = vmov 0.0   ;;  %vm509_vm0 = vmmov 0   ;;  %s764_s0 = inlined_call_operand.vmem [shape: f32[8,128], index: 0, kind: input, shape index: {}]   ;;  %s765_s1 = inlined_call_operand.vmem [shape: f32[128,128], index: 1, kind: input, shape index: {}]   ;;  %s766_s2 = inlined_call_operand.vmem [shape: f32[1,128], index: 2, kind: input, shape index: {}]   ;;  %s767_s3 = inlined_call_operand.vmem [shape: f32[128,128], index: 3, kind: input, shape index: {}]   ;;  %s768_s4 = inlined_call_operand.vmem [shape: f32[1,128], index: 4, kind: input, shape index: {}]   ;;  %s769_s5 = inlined_call_operand.vmem [shape: f32[128,128], index: 5, kind: input, shape index: {}]   ;;  %s770_s6 = inlined_call_operand.vmem [shape: f32[1,128], index: 6, kind: input, shape index: {}]   ;;  %s771_s7 = inlined_call_operand.hbm [shape: f32[8,128], index: 7, kind: output, shape index: {}]  }
   0x1   :  { %v43_v0 = vld [vmem:[%s765_s1 + $0x78] sm:$0xff]  ;;  %378 = vmatprep.subr.mxu0 %v508_v1  ;;  %v42_v2 = vld [vmem:[%s765_s1 + $0x70] sm:$0xff]  ;;  %410 = vmatprep.mubr.msk.f32.mxu0 %vm509_vm0, %v508_v1  ;;  %v41_v3 = vld [vmem:[%s765_s1 + $0x68] sm:$0xff] }
   0x2   :  { %379 = vmatpush3.msra.mxu0 %v43_v0  ;;  %413 = vmatprep.subr.mxu1 %v508_v1  ;;  %v40_v4 = vld [vmem:[%s765_s1 + $0x60] sm:$0xff]  ;;  %v137_v5 = vld [vmem:[%s767_s3 + $0x78] sm:$0xff]  ;;  %v136_v6 = vld [vmem:[%s767_s3 + $0x70] sm:$0xff] }
   0x3   :  { %380 = vmatprep.subr.mxu0 %v508_v1  ;;  %445 = vmatprep.mubr.msk.f32.mxu1 %vm509_vm0, %v508_v1  ;;  %v39_v7 = vld [vmem:[%s765_s1 + $0x58] sm:$0xff]  ;;  %v135_v8 = vld [vmem:[%s767_s3 + $0x68] sm:$0xff]  ;;  %v38_v9 = vld [vmem:[%s765_s1 + $0x50] sm:$0xff] }
   0x4   :  { %381 = vmatpush3.msra.mxu0 %v42_v2  ;;  %414 = vmatpush3.msra.mxu1 %v137_v5  ;;  %v134_v10 = vld [vmem:[%s767_s3 + $0x60] sm:$0xff] }
   0x5   :  { %382 = vmatprep.subr.mxu0 %v508_v1  ;;  %415 = vmatprep.subr.mxu1 %v508_v1 }
   0x6   :  { %383 = vmatpush3.msra.mxu0 %v41_v3  ;;  %416 = vmatpush3.msra.mxu1 %v136_v6 }
   0x7   :  { %384 = vmatprep.subr.mxu0 %v508_v1  ;;  %417 = vmatprep.subr.mxu1 %v508_v1 }
   0x8   :  { %385 = vmatpush3.msra.mxu0 %v40_v4  ;;  %418 = vmatpush3.msra.mxu1 %v135_v8 }
   0x9   :  { %386 = vmatprep.subr.mxu0 %v508_v1 }
   0xa   :  { %387 = vmatpush3.msra.mxu0 %v39_v7 }
   0xb   :  { %12 = vsyncpa [#allocation3], 0  ;;  %388 = vmatprep.subr.mxu0 %v508_v1  ;;  %v37_v11 = vld [vmem:[%s765_s1 + $0x48] sm:$0xff]  ;;  %419 = vmatprep.subr.mxu1 %v508_v1  ;;  %v133_v12 = vld [vmem:[%s767_s3 + $0x58] sm:$0xff]  ;;  %s510_s29 = smov [#allocation2]  }
   0xc   :  { %389 = vmatpush3.msra.mxu0 %v38_v9  ;;  %420 = vmatpush3.msra.mxu1 %v134_v10  ;;  %v36_v13 = vld [vmem:[%s765_s1 + $0x40] sm:$0xff]  ;;  %v132_v14 = vld [vmem:[%s767_s3 + $0x50] sm:$0xff]  ;;  %v35_v15 = vld [vmem:[%s765_s1 + $0x38] sm:$0xff]  ;;  %s316_s30 = sshll.u32 %s510_s29, 4  ;;  %s317_s30 = int_to_ptr.vmem [resolvable:$true] %s316_s30 }
   0xd   :  { %390 = vmatprep.subr.mxu0 %v508_v1  ;;  %421 = vmatprep.subr.mxu1 %v508_v1  ;;  %v131_v16 = vld [vmem:[%s767_s3 + $0x48] sm:$0xff]  ;;  %v34_v17 = vld [vmem:[%s765_s1 + $0x30] sm:$0xff]  ;;  %v130_v18 = vld [vmem:[%s767_s3 + $0x40] sm:$0xff]  ;;  %p491_p1 = scmp.lt.s32.totalorder %s317_s30, %s317_s30 }
   0xe   :  { %391 = vmatpush3.msra.mxu0 %v37_v11  ;;  %422 = vmatpush3.msra.mxu1 %v133_v12  ;;  %v33_v19 = vld [vmem:[%s765_s1 + $0x28] sm:$0xff]  ;;  %v129_v20 = vld [vmem:[%s767_s3 + $0x38] sm:$0xff]  ;;  %v32_v21 = vld [vmem:[%s765_s1 + $0x20] sm:$0xff] }
   0xf   :  { %392 = vmatprep.subr.mxu0 %v508_v1  ;;  %423 = vmatprep.subr.mxu1 %v508_v1  ;;  %v128_v22 = vld [vmem:[%s767_s3 + $0x30] sm:$0xff]  ;;  %v31_v23 = vld [vmem:[%s765_s1 + $0x18] sm:$0xff]  ;;  %v127_v24 = vld [vmem:[%s767_s3 + $0x28] sm:$0xff] }
  0x10   :  { %393 = vmatpush3.msra.mxu0 %v36_v13  ;;  %424 = vmatpush3.msra.mxu1 %v132_v14  ;;  %v30_v25 = vld [vmem:[%s765_s1 + $0x10] sm:$0xff]  ;;  %v126_v26 = vld [vmem:[%s767_s3 + $0x20] sm:$0xff]  ;;  %v29_v27 = vld [vmem:[%s765_s1 + $0x8] sm:$0xff] }
  0x11   :  { %394 = vmatprep.subr.mxu0 %v508_v1  ;;  %425 = vmatprep.subr.mxu1 %v508_v1  ;;  %v125_v28 = vld [vmem:[%s767_s3 + $0x18] sm:$0xff]  ;;  %v28_v29 = vld [vmem:[%s765_s1] sm:$0xff]  ;;  %v124_v31 = vld [vmem:[%s767_s3 + $0x10] sm:$0xff] }
  0x12   :  { %395 = vmatpush3.msra.mxu0 %v35_v15  ;;  %426 = vmatpush3.msra.mxu1 %v131_v16  ;;  %v27_v30 = vld [vmem:[%s764_s0] sm:$0xff]  ;;  %v123_v32 = vld [vmem:[%s767_s3 + $0x8] sm:$0xff]  ;;  %v231_v34 = vld [vmem:[%s769_s5 + $0x78] sm:$0xff] }
  0x13   :  { %396 = vmatprep.subr.mxu0 %v508_v1  ;;  %427 = vmatprep.subr.mxu1 %v508_v1  ;;  %v122_v33 = vld [vmem:[%s767_s3] sm:$0xff]  ;;  %v230_v35 = vld [vmem:[%s769_s5 + $0x70] sm:$0xff]  ;;  %v229_v36 = vld [vmem:[%s769_s5 + $0x68] sm:$0xff] }
  0x14   :  { %397 = vmatpush3.msra.mxu0 %v34_v17  ;;  %428 = vmatpush3.msra.mxu1 %v130_v18  ;;  %v228_v37 = vld [vmem:[%s769_s5 + $0x60] sm:$0xff]  ;;  %v227_v38 = vld [vmem:[%s769_s5 + $0x58] sm:$0xff]  ;;  %v226_v39 = vld [vmem:[%s769_s5 + $0x50] sm:$0xff] }
  0x15   :  { %398 = vmatprep.subr.mxu0 %v508_v1  ;;  %429 = vmatprep.subr.mxu1 %v508_v1  ;;  %v225_v40 = vld [vmem:[%s769_s5 + $0x48] sm:$0xff]  ;;  %v224_v41 = vld [vmem:[%s769_s5 + $0x40] sm:$0xff]  ;;  %v223_v42 = vld [vmem:[%s769_s5 + $0x38] sm:$0xff] }
  0x16   :  { %399 = vmatpush3.msra.mxu0 %v33_v19  ;;  %430 = vmatpush3.msra.mxu1 %v129_v20  ;;  %v222_v43 = vld [vmem:[%s769_s5 + $0x30] sm:$0xff]  ;;  %v221_v44 = vld [vmem:[%s769_s5 + $0x28] sm:$0xff]  ;;  %v220_v45 = vld [vmem:[%s769_s5 + $0x20] sm:$0xff] }
  0x17   :  { %400 = vmatprep.subr.mxu0 %v508_v1  ;;  %431 = vmatprep.subr.mxu1 %v508_v1  ;;  %v219_v46 = vld [vmem:[%s769_s5 + $0x18] sm:$0xff]  ;;  %v324_v47 = vld [vmem:[%s766_s2] ss:$0 sm:$0xff]  ;;  %v218_v52 = vld [vmem:[%s769_s5 + $0x10] sm:$0xff] }
  0x18   :  { %401 = vmatpush3.msra.mxu0 %v32_v21  ;;  %432 = vmatpush3.msra.mxu1 %v128_v22  ;;  %v217_v53 = vld [vmem:[%s769_s5 + $0x8] sm:$0xff]  ;;  %v216_v54 = vld [vmem:[%s769_s5] sm:$0xff]  ;;  %s486_s5 = scalar_lea.vmem %s317_s30, 128 }
  0x19   :  { %402 = vmatprep.subr.mxu0 %v508_v1  ;;  %433 = vmatprep.subr.mxu1 %v508_v1  ;;  %v325_v55 = vld [vmem:[%s768_s4] ss:$0 sm:$0xff]  ;;  %p487_p0 = scmp.ne.s32.totalorder %s317_s30, %s486_s5  ;;  %p492_p2 = scmp.lt.s32.totalorder %s486_s5, %s486_s5 }
  0x1a   :  { %403 = vmatpush3.msra.mxu0 %v31_v23  ;;  %434 = vmatpush3.msra.mxu1 %v127_v24  ;;  %v326_v60 = vld [vmem:[%s770_s6] ss:$0 sm:$0xff] }
  0x1b   :  { %404 = vmatprep.subr.mxu0 %v508_v1  ;;  %435 = vmatprep.subr.mxu1 %v508_v1  ;;  %p493_p3 = por %p492_p2, %p491_p1 }
  0x1c   :  { %405 = vmatpush3.msra.mxu0 %v30_v25  ;;  %436 = vmatpush3.msra.mxu1 %v126_v26 }
  0x1d   :  { %406 = vmatprep.subr.mxu0 %v508_v1  ;;  %437 = vmatprep.subr.mxu1 %v508_v1  ;;  %p494_p4 = pnand %p493_p3, %p487_p0 }
  0x1e   :  { %407 = vmatpush3.msra.mxu0 %v29_v27  ;;  %438 = vmatpush3.msra.mxu1 %v125_v28 }
  0x1f   :  { %408 = vmatprep.subr.mxu0 %v508_v1  ;;  %439 = vmatprep.subr.mxu1 %v508_v1 }
  0x20   :  { %409 = vmatpush3.msra.mxu0 %v28_v29  ;;  %440 = vmatpush3.msra.mxu1 %v124_v31 }
  0x21   :  { %411 = vmatmul.mubr.f32.vlgmr.msra.gmra.mxu0 %v27_v30  ;;  %448 = vmatprep.subr.mxu0 %v508_v1 }
  0x22   :  { %480 = vmatprep.mubr.msk.f32.mxu0 %vm509_vm0, %v508_v1  ;;  %441 = vmatprep.subr.mxu1 %v508_v1 }
  0x23   :  { %442 = vmatpush3.msra.mxu1 %v123_v32  ;;  %449 = vmatpush3.msra.mxu0 %v231_v34 }
  0x24   :  { %443 = vmatprep.subr.mxu1 %v508_v1  ;;  %450 = vmatprep.subr.mxu0 %v508_v1 }
  0x25   :  { %444 = vmatpush3.msra.mxu1 %v122_v33  ;;  %451 = vmatpush3.msra.mxu0 %v230_v35 }
  0x26   :  { %452 = vmatprep.subr.mxu0 %v508_v1 }
  0x27   :  { %453 = vmatpush3.msra.mxu0 %v229_v36 }
  0x28   :  { %454 = vmatprep.subr.mxu0 %v508_v1 }
  0x29   :  { %455 = vmatpush3.msra.mxu0 %v228_v37 }
  0x2a   :  { %456 = vmatprep.subr.mxu0 %v508_v1 }
  0x2b   :  { %457 = vmatpush3.msra.mxu0 %v227_v38 }
  0x2c   :  { %458 = vmatprep.subr.mxu0 %v508_v1 }
  0x2d   :  { %459 = vmatpush3.msra.mxu0 %v226_v39 }
  0x2e   :  { %460 = vmatprep.subr.mxu0 %v508_v1 }
  0x2f   :  { %461 = vmatpush3.msra.mxu0 %v225_v40 }
  0x30   :  { %462 = vmatprep.subr.mxu0 %v508_v1 }
  0x31   :  { %463 = vmatpush3.msra.mxu0 %v224_v41 }
  0x32   :  { %464 = vmatprep.subr.mxu0 %v508_v1 }
  0x33   :  { %465 = vmatpush3.msra.mxu0 %v223_v42 }
  0x34   :  { %466 = vmatprep.subr.mxu0 %v508_v1 }
  0x35   :  { %467 = vmatpush3.msra.mxu0 %v222_v43 }
  0x36   :  { %468 = vmatprep.subr.mxu0 %v508_v1 }
  0x37   :  { %469 = vmatpush3.msra.mxu0 %v221_v44 }
  0x38   :  { %470 = vmatprep.subr.mxu0 %v508_v1 }
  0x39   :  { %471 = vmatpush3.msra.mxu0 %v220_v45 }
  0x3a   :  { %472 = vmatprep.subr.mxu0 %v508_v1 }
  0x3b   :  { %473 = vmatpush3.msra.mxu0 %v219_v46 }
  0x3c   :  { %474 = vmatprep.subr.mxu0 %v508_v1 }
  0x3d   :  { %475 = vmatpush3.msra.mxu0 %v218_v52 }
  0x3e   :  { %476 = vmatprep.subr.mxu0 %v508_v1 }
  0x3f   :  { %477 = vmatpush3.msra.mxu0 %v217_v53 }
  0x40   :  { %478 = vmatprep.subr.mxu0 %v508_v1 }
  0x41   :  { %479 = vmatpush3.msra.mxu0 %v216_v54 }
  0xe1   :  { %v117_v48 = vpop.f32.mrf.mxu0 }
  0xe2   :  { %v118_v49 = vadd.f32 %v324_v47, %v117_v48 }
  0xe3   :  { %v412_v50 = vpop.f32.mrf.mxu0 }
  0xe4   :  { %v121_v51 = vmax.f32 %v118_v49, 0.0 }
  0xe6   :  { %446 = vmatmul.mubr.f32.vlgmr.msra.gmra.mxu1 %v121_v51 }
 0x1a6   :  { %v211_v56 = vpop.f32.mrf.mxu1 }
 0x1a7   :  { %v212_v57 = vadd.f32 %v325_v55, %v211_v56 }
 0x1a8   :  { %v447_v58 = vpop.f32.mrf.mxu1 }
 0x1a9   :  { %v215_v59 = vmax.f32 %v212_v57, 0.0 }
 0x1ab   :  { %481 = vmatmul.mubr.f32.vlgmr.msra.gmra.mxu0 %v215_v59 }
 0x26b   :  { %v305_v61 = vpop.f32.mrf.mxu0 }
 0x26c   :  { %v306_v62 = vadd.f32 %v326_v60, %v305_v61 }
 0x26d   :  { %v482_v63 = vpop.f32.mrf.mxu0 }
 0x26e   :  { %309 = vst [vmem:[#allocation2] sm:$0xff] %v306_v62 }
 0x26f   :  { %497 = shalt.err (!%p494_p4)
}
 0x270   :  { %319 = dma.vmem_to_hbm [thread:$0]  %s317_s30, 128, %s771_s7, [#allocation3]  }
 0x271   :  { %506 = dma.done.wait [#allocation3], 128  }
 0x272   :  { %507 = vsyncadd [#allocation3], 4294967168 }
 0x273   :  { %323 = vsyncpa [#allocation3], 1 }

// kernel: _mlp_forward_impl.1
= control target key start
LH: loop header
LB: loop body
LE: loop exit
PB: predicated region body
PF: predicated region fallthrough
CT: control target
= control target key end

     0   :  { %v508_v1 = vmov 0.0   ;;  %vm509_vm0 = vmmov 0   ;;  %s764_s0 = inlined_call_operand.vmem [shape: f32[8,128], index: 0, kind: input, shape index: {}]   ;;  %s765_s1 = inlined_call_operand.vmem [shape: f32[128,128], index: 1, kind: input, shape index: {}]   ;;  %s766_s2 = inlined_call_operand.vmem [shape: f32[1,128], index: 2, kind: input, shape index: {}]   ;;  %s767_s3 = inlined_call_operand.vmem [shape: f32[128,128], index: 3, kind: input, shape index: {}]   ;;  %s768_s4 = inlined_call_operand.vmem [shape: f32[1,128], index: 4, kind: input, shape index: {}]   ;;  %s769_s5 = inlined_call_operand.vmem [shape: f32[128,128], index: 5, kind: input, shape index: {}]   ;;  %s770_s6 = inlined_call_operand.vmem [shape: f32[1,128], index: 6, kind: input, shape index: {}]   ;;  %s771_s7 = inlined_call_operand.hbm [shape: f32[8,128], index: 7, kind: output, shape index: {}]  }
   0x1   :  { %v43_v0 = vld [vmem:[%s765_s1 + $0x78] sm:$0xff]  ;;  %378 = vmatprep.subr.mxu0 %v508_v1  ;;  %v42_v2 = vld [vmem:[%s765_s1 + $0x70] sm:$0xff]  ;;  %410 = vmatprep.mubr.msk.f32.mxu0 %vm509_vm0, %v508_v1  ;;  %v41_v3 = vld [vmem:[%s765_s1 + $0x68] sm:$0xff] }
   0x2   :  { %379 = vmatpush3.msra.mxu0 %v43_v0  ;;  %413 = vmatprep.subr.mxu1 %v508_v1  ;;  %v40_v4 = vld [vmem:[%s765_s1 + $0x60] sm:$0xff]  ;;  %v137_v5 = vld [vmem:[%s767_s3 + $0x78] sm:$0xff]  ;;  %v136_v6 = vld [vmem:[%s767_s3 + $0x70] sm:$0xff] }
   0x3   :  { %380 = vmatprep.subr.mxu0 %v508_v1  ;;  %445 = vmatprep.mubr.msk.f32.mxu1 %vm509_vm0, %v508_v1  ;;  %v39_v7 = vld [vmem:[%s765_s1 + $0x58] sm:$0xff]  ;;  %v135_v8 = vld [vmem:[%s767_s3 + $0x68] sm:$0xff]  ;;  %v38_v9 = vld [vmem:[%s765_s1 + $0x50] sm:$0xff] }
   0x4   :  { %381 = vmatpush3.msra.mxu0 %v42_v2  ;;  %414 = vmatpush3.msra.mxu1 %v137_v5  ;;  %v134_v10 = vld [vmem:[%s767_s3 + $0x60] sm:$0xff] }
   0x5   :  { %382 = vmatprep.subr.mxu0 %v508_v1  ;;  %415 = vmatprep.subr.mxu1 %v508_v1 }
   0x6   :  { %383 = vmatpush3.msra.mxu0 %v41_v3  ;;  %416 = vmatpush3.msra.mxu1 %v136_v6 }
   0x7   :  { %384 = vmatprep.subr.mxu0 %v508_v1  ;;  %417 = vmatprep.subr.mxu1 %v508_v1 }
   0x8   :  { %385 = vmatpush3.msra.mxu0 %v40_v4  ;;  %418 = vmatpush3.msra.mxu1 %v135_v8 }
   0x9   :  { %386 = vmatprep.subr.mxu0 %v508_v1 }
   0xa   :  { %387 = vmatpush3.msra.mxu0 %v39_v7 }
   0xb   :  { %12 = vsyncpa [#allocation3], 0  ;;  %388 = vmatprep.subr.mxu0 %v508_v1  ;;  %v37_v11 = vld [vmem:[%s765_s1 + $0x48] sm:$0xff]  ;;  %419 = vmatprep.subr.mxu1 %v508_v1  ;;  %v133_v12 = vld [vmem:[%s767_s3 + $0x58] sm:$0xff]  ;;  %s510_s29 = smov [#allocation2]  }
   0xc   :  { %389 = vmatpush3.msra.mxu0 %v38_v9  ;;  %420 = vmatpush3.msra.mxu1 %v134_v10  ;;  %v36_v13 = vld [vmem:[%s765_s1 + $0x40] sm:$0xff]  ;;  %v132_v14 = vld [vmem:[%s767_s3 + $0x50] sm:$0xff]  ;;  %v35_v15 = vld [vmem:[%s765_s1 + $0x38] sm:$0xff]  ;;  %s316_s30 = sshll.u32 %s510_s29, 4  ;;  %s317_s30 = int_to_ptr.vmem [resolvable:$true] %s316_s30 }
   0xd   :  { %390 = vmatprep.subr.mxu0 %v508_v1  ;;  %421 = vmatprep.subr.mxu1 %v508_v1  ;;  %v131_v16 = vld [vmem:[%s767_s3 + $0x48] sm:$0xff]  ;;  %v34_v17 = vld [vmem:[%s765_s1 + $0x30] sm:$0xff]  ;;  %v130_v18 = vld [vmem:[%s767_s3 + $0x40] sm:$0xff]  ;;  %p491_p1 = scmp.lt.s32.totalorder %s317_s30, %s317_s30 }
   0xe   :  { %391 = vmatpush3.msra.mxu0 %v37_v11  ;;  %422 = vmatpush3.msra.mxu1 %v133_v12  ;;  %v33_v19 = vld [vmem:[%s765_s1 + $0x28] sm:$0xff]  ;;  %v129_v20 = vld [vmem:[%s767_s3 + $0x38] sm:$0xff]  ;;  %v32_v21 = vld [vmem:[%s765_s1 + $0x20] sm:$0xff] }
   0xf   :  { %392 = vmatprep.subr.mxu0 %v508_v1  ;;  %423 = vmatprep.subr.mxu1 %v508_v1  ;;  %v128_v22 = vld [vmem:[%s767_s3 + $0x30] sm:$0xff]  ;;  %v31_v23 = vld [vmem:[%s765_s1 + $0x18] sm:$0xff]  ;;  %v127_v24 = vld [vmem:[%s767_s3 + $0x28] sm:$0xff] }
  0x10   :  { %393 = vmatpush3.msra.mxu0 %v36_v13  ;;  %424 = vmatpush3.msra.mxu1 %v132_v14  ;;  %v30_v25 = vld [vmem:[%s765_s1 + $0x10] sm:$0xff]  ;;  %v126_v26 = vld [vmem:[%s767_s3 + $0x20] sm:$0xff]  ;;  %v29_v27 = vld [vmem:[%s765_s1 + $0x8] sm:$0xff] }
  0x11   :  { %394 = vmatprep.subr.mxu0 %v508_v1  ;;  %425 = vmatprep.subr.mxu1 %v508_v1  ;;  %v125_v28 = vld [vmem:[%s767_s3 + $0x18] sm:$0xff]  ;;  %v28_v29 = vld [vmem:[%s765_s1] sm:$0xff]  ;;  %v124_v31 = vld [vmem:[%s767_s3 + $0x10] sm:$0xff] }
  0x12   :  { %395 = vmatpush3.msra.mxu0 %v35_v15  ;;  %426 = vmatpush3.msra.mxu1 %v131_v16  ;;  %v27_v30 = vld [vmem:[%s764_s0] sm:$0xff]  ;;  %v123_v32 = vld [vmem:[%s767_s3 + $0x8] sm:$0xff]  ;;  %v231_v34 = vld [vmem:[%s769_s5 + $0x78] sm:$0xff] }
  0x13   :  { %396 = vmatprep.subr.mxu0 %v508_v1  ;;  %427 = vmatprep.subr.mxu1 %v508_v1  ;;  %v122_v33 = vld [vmem:[%s767_s3] sm:$0xff]  ;;  %v230_v35 = vld [vmem:[%s769_s5 + $0x70] sm:$0xff]  ;;  %v229_v36 = vld [vmem:[%s769_s5 + $0x68] sm:$0xff] }
  0x14   :  { %397 = vmatpush3.msra.mxu0 %v34_v17  ;;  %428 = vmatpush3.msra.mxu1 %v130_v18  ;;  %v228_v37 = vld [vmem:[%s769_s5 + $0x60] sm:$0xff]  ;;  %v227_v38 = vld [vmem:[%s769_s5 + $0x58] sm:$0xff]  ;;  %v226_v39 = vld [vmem:[%s769_s5 + $0x50] sm:$0xff] }
  0x15   :  { %398 = vmatprep.subr.mxu0 %v508_v1  ;;  %429 = vmatprep.subr.mxu1 %v508_v1  ;;  %v225_v40 = vld [vmem:[%s769_s5 + $0x48] sm:$0xff]  ;;  %v224_v41 = vld [vmem:[%s769_s5 + $0x40] sm:$0xff]  ;;  %v223_v42 = vld [vmem:[%s769_s5 + $0x38] sm:$0xff] }
  0x16   :  { %399 = vmatpush3.msra.mxu0 %v33_v19  ;;  %430 = vmatpush3.msra.mxu1 %v129_v20  ;;  %v222_v43 = vld [vmem:[%s769_s5 + $0x30] sm:$0xff]  ;;  %v221_v44 = vld [vmem:[%s769_s5 + $0x28] sm:$0xff]  ;;  %v220_v45 = vld [vmem:[%s769_s5 + $0x20] sm:$0xff] }
  0x17   :  { %400 = vmatprep.subr.mxu0 %v508_v1  ;;  %431 = vmatprep.subr.mxu1 %v508_v1  ;;  %v219_v46 = vld [vmem:[%s769_s5 + $0x18] sm:$0xff]  ;;  %v324_v47 = vld [vmem:[%s766_s2] ss:$0 sm:$0xff]  ;;  %v218_v52 = vld [vmem:[%s769_s5 + $0x10] sm:$0xff] }
  0x18   :  { %401 = vmatpush3.msra.mxu0 %v32_v21  ;;  %432 = vmatpush3.msra.mxu1 %v128_v22  ;;  %v217_v53 = vld [vmem:[%s769_s5 + $0x8] sm:$0xff]  ;;  %v216_v54 = vld [vmem:[%s769_s5] sm:$0xff]  ;;  %s486_s5 = scalar_lea.vmem %s317_s30, 128 }
  0x19   :  { %402 = vmatprep.subr.mxu0 %v508_v1  ;;  %433 = vmatprep.subr.mxu1 %v508_v1  ;;  %v325_v55 = vld [vmem:[%s768_s4] ss:$0 sm:$0xff]  ;;  %p487_p0 = scmp.ne.s32.totalorder %s317_s30, %s486_s5  ;;  %p492_p2 = scmp.lt.s32.totalorder %s486_s5, %s486_s5 }
  0x1a   :  { %403 = vmatpush3.msra.mxu0 %v31_v23  ;;  %434 = vmatpush3.msra.mxu1 %v127_v24  ;;  %v326_v60 = vld [vmem:[%s770_s6] ss:$0 sm:$0xff] }
  0x1b   :  { %404 = vmatprep.subr.mxu0 %v508_v1  ;;  %435 = vmatprep.subr.mxu1 %v508_v1  ;;  %p493_p3 = por %p492_p2, %p491_p1 }
  0x1c   :  { %405 = vmatpush3.msra.mxu0 %v30_v25  ;;  %436 = vmatpush3.msra.mxu1 %v126_v26 }
  0x1d   :  { %406 = vmatprep.subr.mxu0 %v508_v1  ;;  %437 = vmatprep.subr.mxu1 %v508_v1  ;;  %p494_p4 = pnand %p493_p3, %p487_p0 }
  0x1e   :  { %407 = vmatpush3.msra.mxu0 %v29_v27  ;;  %438 = vmatpush3.msra.mxu1 %v125_v28 }
  0x1f   :  { %408 = vmatprep.subr.mxu0 %v508_v1  ;;  %439 = vmatprep.subr.mxu1 %v508_v1 }
  0x20   :  { %409 = vmatpush3.msra.mxu0 %v28_v29  ;;  %440 = vmatpush3.msra.mxu1 %v124_v31 }
  0x21   :  { %411 = vmatmul.mubr.f32.vlgmr.msra.gmra.mxu0 %v27_v30  ;;  %448 = vmatprep.subr.mxu0 %v508_v1 }
  0x22   :  { %480 = vmatprep.mubr.msk.f32.mxu0 %vm509_vm0, %v508_v1  ;;  %441 = vmatprep.subr.mxu1 %v508_v1 }
  0x23   :  { %442 = vmatpush3.msra.mxu1 %v123_v32  ;;  %449 = vmatpush3.msra.mxu0 %v231_v34 }
  0x24   :  { %443 = vmatprep.subr.mxu1 %v508_v1  ;;  %450 = vmatprep.subr.mxu0 %v508_v1 }
  0x25   :  { %444 = vmatpush3.msra.mxu1 %v122_v33  ;;  %451 = vmatpush3.msra.mxu0 %v230_v35 }
  0x26   :  { %452 = vmatprep.subr.mxu0 %v508_v1 }
  0x27   :  { %453 = vmatpush3.msra.mxu0 %v229_v36 }
  0x28   :  { %454 = vmatprep.subr.mxu0 %v508_v1 }
  0x29   :  { %455 = vmatpush3.msra.mxu0 %v228_v37 }
  0x2a   :  { %456 = vmatprep.subr.mxu0 %v508_v1 }
  0x2b   :  { %457 = vmatpush3.msra.mxu0 %v227_v38 }
  0x2c   :  { %458 = vmatprep.subr.mxu0 %v508_v1 }
  0x2d   :  { %459 = vmatpush3.msra.mxu0 %v226_v39 }
  0x2e   :  { %460 = vmatprep.subr.mxu0 %v508_v1 }
  0x2f   :  { %461 = vmatpush3.msra.mxu0 %v225_v40 }
  0x30   :  { %462 = vmatprep.subr.mxu0 %v508_v1 }
  0x31   :  { %463 = vmatpush3.msra.mxu0 %v224_v41 }
  0x32   :  { %464 = vmatprep.subr.mxu0 %v508_v1 }
  0x33   :  { %465 = vmatpush3.msra.mxu0 %v223_v42 }
  0x34   :  { %466 = vmatprep.subr.mxu0 %v508_v1 }
  0x35   :  { %467 = vmatpush3.msra.mxu0 %v222_v43 }
  0x36   :  { %468 = vmatprep.subr.mxu0 %v508_v1 }
  0x37   :  { %469 = vmatpush3.msra.mxu0 %v221_v44 }
  0x38   :  { %470 = vmatprep.subr.mxu0 %v508_v1 }
  0x39   :  { %471 = vmatpush3.msra.mxu0 %v220_v45 }
  0x3a   :  { %472 = vmatprep.subr.mxu0 %v508_v1 }
  0x3b   :  { %473 = vmatpush3.msra.mxu0 %v219_v46 }
  0x3c   :  { %474 = vmatprep.subr.mxu0 %v508_v1 }
  0x3d   :  { %475 = vmatpush3.msra.mxu0 %v218_v52 }
  0x3e   :  { %476 = vmatprep.subr.mxu0 %v508_v1 }
  0x3f   :  { %477 = vmatpush3.msra.mxu0 %v217_v53 }
  0x40   :  { %478 = vmatprep.subr.mxu0 %v508_v1 }
  0x41   :  { %479 = vmatpush3.msra.mxu0 %v216_v54 }
  0xe1   :  { %v117_v48 = vpop.f32.mrf.mxu0 }
  0xe2   :  { %v118_v49 = vadd.f32 %v324_v47, %v117_v48 }
  0xe3   :  { %v412_v50 = vpop.f32.mrf.mxu0 }
  0xe4   :  { %v121_v51 = vmax.f32 %v118_v49, 0.0 }
  0xe6   :  { %446 = vmatmul.mubr.f32.vlgmr.msra.gmra.mxu1 %v121_v51 }
 0x1a6   :  { %v211_v56 = vpop.f32.mrf.mxu1 }
 0x1a7   :  { %v212_v57 = vadd.f32 %v325_v55, %v211_v56 }
 0x1a8   :  { %v447_v58 = vpop.f32.mrf.mxu1 }
 0x1a9   :  { %v215_v59 = vmax.f32 %v212_v57, 0.0 }
 0x1ab   :  { %481 = vmatmul.mubr.f32.vlgmr.msra.gmra.mxu0 %v215_v59 }
 0x26b   :  { %v305_v61 = vpop.f32.mrf.mxu0 }
 0x26c   :  { %v306_v62 = vadd.f32 %v326_v60, %v305_v61 }
 0x26d   :  { %v482_v63 = vpop.f32.mrf.mxu0 }
 0x26e   :  { %309 = vst [vmem:[#allocation2] sm:$0xff] %v306_v62 }
 0x26f   :  { %497 = shalt.err (!%p494_p4)
}
 0x270   :  { %319 = dma.vmem_to_hbm [thread:$0]  %s317_s30, 128, %s771_s7, [#allocation3]  }
 0x271   :  { %506 = dma.done.wait [#allocation3], 128  }
 0x272   :  { %507 = vsyncadd [#allocation3], 4294967168 }
 0x273   :  { %323 = vsyncpa [#allocation3], 1 }

</bundles_post_ra>
